<compile_context>
chip_gen: v7x
topology: tpu7x:2x2x1
jax: 0.10.0
libtpu: 0.0.40
codegen_flags: <defaults>
</compile_context>

<pallas_src>
import functools

import jax
import jax.numpy as jnp
from jax import lax
from jax.experimental import pallas as pl
from jax.experimental.pallas import tpu as pltpu

LANES = 128
SUBLANES = 8


def _rmsre_kernel(pred_ref, target_ref, out_ref, acc_ref, *,
                  epsilon, valid_tail_rows):
    """Accumulate the sum of squared relative errors into an (8,128) scratch."""
    i = pl.program_id(0)
    last = pl.num_programs(0) - 1

    @pl.when(i == 0)
    def _():
        acc_ref[...] = jnp.zeros_like(acc_ref)

    p = pred_ref[...].astype(jnp.float32)
    t = target_ref[...].astype(jnp.float32)
    # EUP reciprocal (exact) + VPU multiply instead of a generic divide.
    inv = pl.reciprocal(t + epsilon, approx=False)
    rel = (p - t) * inv
    sq = rel * rel

    if valid_tail_rows is not None:
        # Only the final block can read rows past the end of the (padded)
        # array; mask that garbage off the hot path.
        @pl.when(i != last)
        def _():
            acc_ref[...] += sq.reshape(-1, SUBLANES, LANES).sum(axis=0)

        @pl.when(i == last)
        def _():
            row_ids = lax.broadcasted_iota(jnp.int32, sq.shape, 0)
            masked = jnp.where(row_ids < valid_tail_rows, sq, 0.0)
            acc_ref[...] += masked.reshape(-1, SUBLANES, LANES).sum(axis=0)
    else:
        acc_ref[...] += sq.reshape(-1, SUBLANES, LANES).sum(axis=0)

    @pl.when(i == last)
    def _():
        # Single sublane reduce -> lane-dense (1, 128) partial (unmasked store).
        out_ref[...] = jnp.sum(acc_ref[...], axis=0, keepdims=True)


def rmsre_loss(pred, target, epsilon=1e-8, row_tile=4096):
    """Pallas implementation of RMSRELoss.forward (scalar output)."""
    assert pred.shape == target.shape
    assert row_tile % SUBLANES == 0
    n_elems = pred.size

    # Pad the flattened element count to a multiple of 8*128 so n_rows is a
    # multiple of 8.  Zero padding in *both* tensors contributes exactly 0.
    chunk = SUBLANES * LANES
    n_rows = SUBLANES * pl.cdiv(n_elems, chunk)
    padded = n_rows * LANES

    pred_f = pred.reshape(-1)
    target_f = target.reshape(-1)
    if padded != n_elems:
        pred_f = jnp.pad(pred_f, (0, padded - n_elems))
        target_f = jnp.pad(target_f, (0, padded - n_elems))
    pred_2d = pred_f.reshape(n_rows, LANES)
    target_2d = target_f.reshape(n_rows, LANES)

    # Block size: whole array if it fits, otherwise row_tile rows (mult. of 8).
    row_tile_eff = n_rows if n_rows <= row_tile else row_tile
    n_blocks = pl.cdiv(n_rows, row_tile_eff)

    tail = n_rows % row_tile_eff
    valid_tail_rows = tail if tail != 0 else None  # static -> masking only if needed

    itemsize = (jnp.dtype(pred.dtype).itemsize
                + jnp.dtype(target.dtype).itemsize)
    cost = pl.CostEstimate(
        flops=5 * n_elems,
        transcendentals=n_elems,
        bytes_accessed=n_elems * itemsize,
    )

    kernel = functools.partial(
        _rmsre_kernel,
        epsilon=float(epsilon),
        valid_tail_rows=valid_tail_rows,
    )

    partial_row = pl.pallas_call(
        kernel,
        out_shape=jax.ShapeDtypeStruct((1, LANES), jnp.float32),
        grid_spec=pltpu.PrefetchScalarGridSpec(
            num_scalar_prefetch=0,
            grid=(n_blocks,),
            in_specs=[
                pl.BlockSpec((row_tile_eff, LANES), lambda i: (i, 0)),
                pl.BlockSpec((row_tile_eff, LANES), lambda i: (i, 0)),
            ],
            out_specs=pl.BlockSpec((1, LANES), lambda i: (0, 0)),
            scratch_shapes=[pltpu.VMEM((SUBLANES, LANES), jnp.float32)],
        ),
        compiler_params=pltpu.CompilerParams(
            dimension_semantics=("arbitrary",),
        ),
        cost_estimate=cost,
    )(pred_2d, target_2d)

    total = jnp.sum(partial_row)
    return jnp.sqrt(total / jnp.float32(n_elems))


if __name__ == "__main__":
    key = jax.random.PRNGKey(0)
    k1, k2 = jax.random.split(key)

    # Small shapes consistent with a generic regression loss input (NCHW).
    pred = jax.random.normal(k1, (2, 4, 16, 16), dtype=jnp.float32)
    target = jax.random.normal(k2, (2, 4, 16, 16), dtype=jnp.float32) + 2.0

    loss = rmsre_loss(pred, target)
    loss = jax.block_until_ready(loss)

    # Pure-JAX reference check.
    eps = 1e-8
    rel = (pred - target) / (target + eps)
    ref = jnp.sqrt(jnp.mean(rel * rel))
    assert jnp.allclose(loss, ref, rtol=1e-5, atol=1e-6), (loss, ref)

    print("KERNEL_OK")
</pallas_src>

<mosaic_0001>
module attributes {stable_mosaic.version = 11 : i64} {
  func.func @_rmsre_kernel(%arg0: i32, %arg1: memref<16x128xf32, #tpu.memory_space<vmem>>, %arg2: memref<16x128xf32, #tpu.memory_space<vmem>>, %arg3: memref<1x128xf32, #tpu.memory_space<vmem>>, %arg4: memref<8x128xf32, #tpu.memory_space<vmem>>) attributes {dimension_semantics = [#tpu.dimension_semantics<arbitrary>], iteration_bounds = array<i64: 1>, scalar_prefetch = 0 : i64, scratch_operands = 1 : i64, tpu.core_type = #tpu.core_type<tc>, window_params = [{transform_indices = @transform_0, window_bounds = array<i64: 16, 128>}, {transform_indices = @transform_1, window_bounds = array<i64: 16, 128>}, {pipeline_mode = #tpu.pipeline_mode<synchronous>, transform_indices = @transform_2, window_bounds = array<i64: 1, 128>}]} {
    %c0_i32 = arith.constant 0 : i32
    %0 = arith.cmpi eq, %arg0, %c0_i32 : i32
    %1 = arith.extui %0 : i1 to i32
    %c0_i32_0 = arith.constant 0 : i32
    %2 = arith.cmpi ne, %1, %c0_i32_0 : i32
    scf.if %2 {
      %cst_11 = arith.constant 0.000000e+00 : f32
      %19 = vector.broadcast %cst_11 : f32 to vector<8x128xf32>
      %c0_12 = arith.constant 0 : index
      %c0_13 = arith.constant 0 : index
      %20 = vector.load %arg4[%c0_12, %c0_13] : memref<8x128xf32, #tpu.memory_space<vmem>>, vector<8x128xf32>
      tpu.vector_store %arg4[%c0_12, %c0_13], %19 {strides = array<i32>} : memref<8x128xf32, #tpu.memory_space<vmem>>, vector<8x128xf32>,
    } else {
    }
    %c0 = arith.constant 0 : index
    %c0_1 = arith.constant 0 : index
    %3 = vector.load %arg1[%c0, %c0_1] : memref<16x128xf32, #tpu.memory_space<vmem>>, vector<16x128xf32>
    %c0_2 = arith.constant 0 : index
    %c0_3 = arith.constant 0 : index
    %4 = vector.load %arg2[%c0_2, %c0_3] : memref<16x128xf32, #tpu.memory_space<vmem>>, vector<16x128xf32>
    %cst = arith.constant 9.99999993E-9 : f32
    %5 = vector.broadcast %cst : f32 to vector<16x128xf32>
    %6 = arith.addf %4, %5 : vector<16x128xf32>
    %7 = tpu.reciprocal %6 : vector<16x128xf32> -> vector<16x128xf32>
    %8 = arith.subf %3, %4 : vector<16x128xf32>
    %9 = arith.mulf %8, %7 : vector<16x128xf32>
    %10 = arith.mulf %9, %9 : vector<16x128xf32>
    %c0_4 = arith.constant 0 : index
    %c0_5 = arith.constant 0 : index
    %11 = vector.load %arg4[%c0_4, %c0_5] : memref<8x128xf32, #tpu.memory_space<vmem>>, vector<8x128xf32>
    %12 = vector.shape_cast %10 : vector<16x128xf32> to vector<2x8x128xf32>
    %cst_6 = arith.constant dense<0.000000e+00> : vector<8x128xf32>
    %13 = vector.multi_reduction <add>, %12, %cst_6 [0] : vector<2x8x128xf32> to vector<8x128xf32>
    %14 = arith.addf %11, %13 : vector<8x128xf32>
    %c0_7 = arith.constant 0 : index
    %c0_8 = arith.constant 0 : index
    %15 = vector.load %arg4[%c0_7, %c0_8] : memref<8x128xf32, #tpu.memory_space<vmem>>, vector<8x128xf32>
    tpu.vector_store %arg4[%c0_7, %c0_8], %14 {strides = array<i32>} : memref<8x128xf32, #tpu.memory_space<vmem>>, vector<8x128xf32>,
    %c0_i32_9 = arith.constant 0 : i32
    %16 = arith.cmpi eq, %arg0, %c0_i32_9 : i32
    %17 = arith.extui %16 : i1 to i32
    %c0_i32_10 = arith.constant 0 : i32
    %18 = arith.cmpi ne, %17, %c0_i32_10 : i32
    scf.if %18 {
      %c0_11 = arith.constant 0 : index
      %c0_12 = arith.constant 0 : index
      %19 = vector.load %arg4[%c0_11, %c0_12] : memref<8x128xf32, #tpu.memory_space<vmem>>, vector<8x128xf32>
      %cst_13 = arith.constant dense<0.000000e+00> : vector<128xf32>
      %20 = vector.multi_reduction <add>, %19, %cst_13 [0] : vector<8x128xf32> to vector<128xf32>
      %21 = vector.shape_cast %20 : vector<128xf32> to vector<1x128xf32>
      %c0_14 = arith.constant 0 : index
      %c0_15 = arith.constant 0 : index
      %22 = vector.load %arg3[%c0_14, %c0_15] : memref<1x128xf32, #tpu.memory_space<vmem>>, vector<1x128xf32>
      tpu.vector_store %arg3[%c0_14, %c0_15], %21 {strides = array<i32>} : memref<1x128xf32, #tpu.memory_space<vmem>>, vector<1x128xf32>,
    } else {
    }
    return
  }
  func.func @transform_0(%arg0: i32) -> (i32, i32) {
    %c0_i32 = arith.constant 0 : i32
    %c0_i32_0 = arith.constant 0 : i32
    return %arg0, %c0_i32 : i32, i32
  }
  func.func @transform_1(%arg0: i32) -> (i32, i32) {
    %c0_i32 = arith.constant 0 : i32
    %c0_i32_0 = arith.constant 0 : i32
    return %arg0, %c0_i32 : i32, i32
  }
  func.func @transform_2(%arg0: i32) -> (i32, i32) {
    %c0_i32 = arith.constant 0 : i32
    %c0_i32_0 = arith.constant 0 : i32
    %c0_i32_1 = arith.constant 0 : i32
    return %c0_i32, %c0_i32_0 : i32, i32
  }
}

</mosaic_0001>

<bundles_post_ra>
// kernel: tpu_custom_call.1
= control target key start
LH: loop header
LB: loop body
LE: loop exit
PB: predicated region body
PF: predicated region fallthrough
CT: control target
= control target key end

     0   :  { %7 = vsyncpa [#allocation4], 0  ;;  %s227_s0 = inlined_call_operand.hbm [shape: f32[16,128], index: 0, kind: input, shape index: {}]   ;;  %s228_s1 = inlined_call_operand.hbm [shape: f32[16,128], index: 1, kind: input, shape index: {}]   ;;  %s229_s2 = inlined_call_operand.hbm [shape: f32[1,128], index: 2, kind: output, shape index: {}]  }
   0x1   :  { %8 = vsyncpa [#allocation7], 0 }
   0x2   :  { %9 = vsyncpa [#allocation5], 0  ;;  %s171_s9 = smov [#allocation3]   ;;  %s99_s13 = scalar_lea.hbm %s227_s0, 256 }
   0x3   :  { %s15_s10 = sshll.u32 %s171_s9, 4  ;;  %p100_p0 = scmp.ne.s32.totalorder %s227_s0, %s99_s13  ;;  %s16_s10 = int_to_ptr.vmem [resolvable:$true] %s15_s10 }
   0x4   :  { %p103_p1 = scmp.lt.u32.totalorder %s99_s13, %s227_s0 }
   0x6   :  { %p105_p2 = pnand %p103_p1, %p100_p0 }
   0x8   :  { %108 = shalt.err (!%p105_p2)
}
   0x9   :  { %s109_s18 = scalar_lea.vmem %s16_s10, 256  ;;  %p114_p4 = scmp.lt.s32.totalorder %s16_s10, %s16_s10 }
   0xa   :  { %p110_p3 = scmp.ne.s32.totalorder %s16_s10, %s109_s18  ;;  %p115_p5 = scmp.lt.s32.totalorder %s109_s18, %s109_s18 }
   0xc   :  { %p116_p6 = por %p115_p5, %p114_p4 }
   0xe   :  { %p117_p7 = pnand %p116_p6, %p110_p3 }
  0x10   :  { %120 = shalt.err (!%p117_p7)
}
  0x11   :  { %s172_s19 = smov 128   ;;  %s173_s20 = smov 8  }
  0x12   :  { %21 = dma.hbm_to_vmem [thread:$0]  %s227_s0, 256, %s16_s10, [#allocation4], %s172_s19, %s172_s19, %s173_s20  }
  0x13   :  { %s174_s23 = smov [#allocation6]   ;;  %s121_s27 = scalar_lea.hbm %s228_s1, 256 }
  0x14   :  { %s27_s24 = sshll.u32 %s174_s23, 4  ;;  %p122_p8 = scmp.ne.s32.totalorder %s228_s1, %s121_s27  ;;  %s28_s24 = int_to_ptr.vmem [resolvable:$true] %s27_s24 }
  0x15   :  { %p125_p9 = scmp.lt.u32.totalorder %s121_s27, %s228_s1 }
  0x17   :  { %p127_p10 = pnand %p125_p9, %p122_p8 }
  0x19   :  { %130 = shalt.err (!%p127_p10)
}
  0x1a   :  { %s131_s4 = scalar_lea.vmem %s28_s24, 256  ;;  %p136_p12 = scmp.lt.s32.totalorder %s28_s24, %s28_s24 }
  0x1b   :  { %p132_p11 = scmp.ne.s32.totalorder %s28_s24, %s131_s4  ;;  %p137_p13 = scmp.lt.s32.totalorder %s131_s4, %s131_s4 }
  0x1d   :  { %p138_p0 = por %p137_p13, %p136_p12 }
  0x1f   :  { %p139_p1 = pnand %p138_p0, %p132_p11 }
  0x21   :  { %142 = shalt.err (!%p139_p1)
}
  0x22   :  { %33 = dma.hbm_to_vmem [thread:$0]  %s228_s1, 256, %s28_s24, [#allocation7], %s172_s19, %s172_s19, %s173_s20  }
  0x23   :  { %165 = dma.done.wait [#allocation4], 256  }
  0x24   :  { %166 = vsyncadd [#allocation4], 4294967040 }
  0x25   :  { %167 = dma.done.wait [#allocation7], 256  }
  0x26   :  { %168 = vsyncadd [#allocation7], 4294967040  ;;  %v47_v0 = vld [vmem:[#allocation6] sm:$0xff]  ;;  %v48_v1 = vld [vmem:[#allocation6 + $0x8] sm:$0xff]  ;;  %s175_s1 = smov [#allocation8]  }
  0x27   :  { %v49_v2 = vadd.f32 1e-08, %v47_v0  ;;  %v50_v3 = vadd.f32 1e-08, %v48_v1  ;;  %v45_v4 = vld [vmem:[#allocation3] sm:$0xff]  ;;  %v46_v5 = vld [vmem:[#allocation3 + $0x8] sm:$0xff] }
  0x28   :  { %v53_v6 = vsub.f32 %v45_v4, %v47_v0  ;;  %v54_v7 = vsub.f32 %v46_v5, %v48_v1  ;;  %s80_s6 = sshll.u32 %s175_s1, 4  ;;  %s81_s6 = int_to_ptr.vmem [resolvable:$true] %s80_s6 }
  0x29   :  { %95 = vrcp.f32 %v49_v2  ;;  %s143_s7 = scalar_lea.vmem %s81_s6, 16  ;;  %s147_s8 = scalar_lea.vmem %s81_s6, 32 }
  0x2a   :  { %97 = vrcp.f32 %v50_v3  ;;  %p144_p2 = scmp.ne.s32.totalorder %s81_s6, %s143_s7  ;;  %p148_p3 = scmp.lt.s32.totalorder %s81_s6, %s81_s6 }
  0x2b   :  { %p149_p4 = scmp.lt.s32.totalorder %s147_s8, %s143_s7 }
  0x2d   :  { %p150_p5 = por %p149_p4, %p148_p3 }
  0x2f   :  { %p151_p6 = pnand %p150_p5, %p144_p2 }
  0x33   :  { %v96_v8 = vpop.eup %95 }
  0x34   :  { %v98_v9 = vpop.eup %97  ;;  %v55_v10 = vmul.f32 %v96_v8, %v53_v6 }
  0x35   :  { %v56_v11 = vmul.f32 %v98_v9, %v54_v7 }
  0x36   :  { %v57_v12 = vmul.f32 %v55_v10, %v55_v10 }
  0x37   :  { %v58_v13 = vmul.f32 %v56_v11, %v56_v11 }
  0x39   :  { %v60_v14 = vadd.f32 %v58_v13, %v57_v12 }
  0x3b   :  { %v67_v15 = vrot.slane %v60_v14, 4 }
  0x3d   :  { %v68_v16 = vadd.f32 %v67_v15, %v60_v14 }
  0x3f   :  { %v69_v17 = vrot.slane %v68_v16, 2 }
  0x41   :  { %v70_v18 = vadd.f32 %v69_v17, %v68_v16 }
  0x43   :  { %v71_v19 = vrot.slane %v70_v18, 1 }
  0x45   :  { %v72_v20 = vadd.f32 %v71_v19, %v70_v18 }
  0x47   :  { %73 = vst [vmem:[#allocation8] sm:$0x1] %v72_v20 }
  0x48   :  { %154 = shalt.err (!%p151_p6)
}
  0x49   :  { %s155_s11 = scalar_lea.hbm %s229_s2, 16 }
  0x4a   :  { %p156_p7 = scmp.ne.s32.totalorder %s229_s2, %s155_s11  ;;  %p159_p8 = scmp.lt.u32.totalorder %s155_s11, %s229_s2 }
  0x4c   :  { %p161_p9 = pnand %p159_p8, %p156_p7 }
  0x4e   :  { %164 = shalt.err (!%p161_p9)
}
  0x4f   :  { %83 = dma.vmem_to_hbm [thread:$0]  %s81_s6, 16, %s229_s2, [#allocation5]  }
  0x50   :  { %169 = dma.done.wait [#allocation5], 16  }
  0x51   :  { %170 = vsyncadd [#allocation5], 4294967280 }
  0x52   :  { %87 = vsyncpa [#allocation4], 1 }
  0x53   :  { %88 = vsyncpa [#allocation7], 1 }
  0x54   :  { %89 = vsyncpa [#allocation5], 1 }

</bundles_post_ra>
